<compile_context>
chip_gen: v7x
topology: tpu7x:2x2x1
jax: 0.10.0
libtpu: 0.0.40
codegen_flags: <defaults>
</compile_context>

<pallas_src>
import math
from typing import Dict

import jax
import jax.numpy as jnp
from jax.experimental import pallas as pl
from jax.experimental.pallas import tpu as pltpu


def _fused_embedding_kernel(idx_ref, table_ref, out_ref):
    """All-fields embedding lookup as one one-hot matmul on the MXU.

    idx_ref:   (G, F)          int32   VMEM  (already offset per field)
    table_ref: (sum_T, sum_D)  float32 VMEM  (block-diagonal combined table)
    out_ref:   (G, sum_D)      float32 VMEM  (concatenated graph_attrs)
    """
    G, F = idx_ref.shape
    S = table_ref.shape[0]
    # (G, S) column ids, compared against each field's (offset) index column.
    col_ids = jax.lax.broadcasted_iota(jnp.int32, (G, S), 1)
    # Row offsets make per-field hot columns disjoint, so summing per-field
    # one-hots gives a single selection matrix whose matmul against the
    # block-diagonal table yields the concatenated per-field embeddings.
    onehot = (col_ids == idx_ref[:, 0:1]).astype(table_ref.dtype)
    for f in range(1, F):  # F is a tiny static count of attribute fields
        onehot = onehot + (col_ids == idx_ref[:, f:f + 1]).astype(table_ref.dtype)
    out_ref[...] = jnp.dot(
        onehot, table_ref[...], preferred_element_type=jnp.float32
    ).astype(out_ref.dtype)


def fused_embedding_lookup(idx_offset: jax.Array, combined_table: jax.Array) -> jax.Array:
    """Single Pallas call: (G, F) int32 indices + (sum_T, sum_D) table -> (G, sum_D)."""
    G = idx_offset.shape[0]
    sum_D = combined_table.shape[1]
    return pl.pallas_call(
        _fused_embedding_kernel,
        out_shape=jax.ShapeDtypeStruct((G, sum_D), combined_table.dtype),
        in_specs=[
            pl.BlockSpec(memory_space=pltpu.MemorySpace.VMEM),
            pl.BlockSpec(memory_space=pltpu.MemorySpace.VMEM),
        ],
        out_specs=pl.BlockSpec(memory_space=pltpu.MemorySpace.VMEM),
    )(idx_offset, combined_table)


class EmbeddingGraphAttrs:
    """JAX/Pallas port of geqtrain EmbeddingGraphAttrs (forward semantics preserved)."""

    GRAPH_ATTRS_KEY = "graph_attrs"

    def __init__(self, graph_attributes: Dict[str, Dict], key: jax.Array):
        self.attributes_to_embed = {}
        self.tables = {}           # per-field tables (kept for inspection / reference)
        row_offsets = []
        field_order = []
        row_off = 0
        col_off = 0
        sizes = []
        for field, values in graph_attributes.items():
            n_types = values.get("num_types") + 1
            embedding_dim = values["embedding_dimensionality"]
            key, sub = jax.random.split(key)
            # Matches torch.nn.init.normal_(weight, mean=0, std=math.isqrt(embedding_dim))
            # NOTE: math.isqrt is the *integer floor* sqrt, as in the original module.
            std = float(math.isqrt(embedding_dim))
            weight = std * jax.random.normal(
                sub, (n_types, embedding_dim), dtype=jnp.float32
            )
            emb_layer_name = f"{field}_embedding"
            self.attributes_to_embed[field] = emb_layer_name
            self.tables[emb_layer_name] = weight
            field_order.append(field)
            row_offsets.append(row_off)
            sizes.append((row_off, col_off, n_types, embedding_dim))
            row_off += n_types
            col_off += embedding_dim

        self.field_order = field_order
        self.sum_types = row_off
        self.sum_dim = col_off

        if field_order:
            # Precompute the block-diagonal combined table once (plain JAX, no kernel).
            combined = jnp.zeros((self.sum_types, self.sum_dim), dtype=jnp.float32)
            for field, (r0, c0, nT, D) in zip(field_order, sizes):
                w = self.tables[f"{field}_embedding"]
                combined = combined.at[r0:r0 + nT, c0:c0 + D].set(w)
            self.combined_table = combined
            self.row_offsets = jnp.asarray(row_offsets, dtype=jnp.int32)  # (F,)
        else:
            self.combined_table = None
            self.row_offsets = None

    def __call__(self, data: Dict[str, jax.Array]) -> Dict[str, jax.Array]:
        if not self.attributes_to_embed:
            return data
        # Stack all field indices once: (G, F) int32, then add per-field row offsets.
        # reshape(-1) instead of squeeze() so G == 1 doesn't collapse to a scalar.
        idx = jnp.stack(
            [jnp.reshape(data[f], (-1,)).astype(jnp.int32) for f in self.field_order],
            axis=-1,
        )
        idx_offset = idx + self.row_offsets[None, :]
        data[self.GRAPH_ATTRS_KEY] = fused_embedding_lookup(
            idx_offset, self.combined_table
        )
        return data


if __name__ == "__main__":
    key = jax.random.PRNGKey(0)

    # Module config: two graph attributes with different type counts / dims.
    graph_attributes = {
        "temperature": {"num_types": 5, "embedding_dimensionality": 8},
        "solvent": {"num_types": 3, "embedding_dimensionality": 16},
    }

    key, k_mod, k_t, k_s = jax.random.split(key, 4)
    module = EmbeddingGraphAttrs(graph_attributes, k_mod)

    num_graphs = 8
    data = {
        "temperature": jax.random.randint(
            k_t, (num_graphs, 1), 0, graph_attributes["temperature"]["num_types"] + 1
        ),
        "solvent": jax.random.randint(
            k_s, (num_graphs, 1), 0, graph_attributes["solvent"]["num_types"] + 1
        ),
    }

    out_data = module(dict(data))
    graph_attrs = jax.block_until_ready(out_data[EmbeddingGraphAttrs.GRAPH_ATTRS_KEY])

    # Pure-JAX reference (plain per-field gather + concat) to verify fused kernel.
    ref = jnp.concatenate(
        [
            jnp.take(module.tables["temperature_embedding"],
                     jnp.reshape(data["temperature"], (-1,)), axis=0),
            jnp.take(module.tables["solvent_embedding"],
                     jnp.reshape(data["solvent"], (-1,)), axis=0),
        ],
        axis=-1,
    )
    assert graph_attrs.shape == (num_graphs, 8 + 16)
    assert jnp.allclose(graph_attrs, ref, atol=1e-5, rtol=1e-5)

    print("KERNEL_OK")
</pallas_src>

<mosaic_0001>
module attributes {stable_mosaic.version = 11 : i64} {
  func.func @_fused_embedding_kernel(%arg0: memref<8x2xi32, #tpu.memory_space<vmem>>, %arg1: memref<10x24xf32, #tpu.memory_space<vmem>>, %arg2: memref<8x24xf32, #tpu.memory_space<vmem>>) attributes {dimension_semantics = [], scalar_prefetch = 0 : i64, scratch_operands = 0 : i64, tpu.core_type = #tpu.core_type<tc>} {
    %0 = tpu.iota {dimensions = array<i32: 1>} : vector<8x10xi32>
    %c0 = arith.constant 0 : index
    %c0_0 = arith.constant 0 : index
    %1 = vector.load %arg0[%c0, %c0_0] : memref<8x2xi32, #tpu.memory_space<vmem>>, vector<8x1xi32>
    %2 = vector.broadcast %1 : vector<8x1xi32> to vector<8x10xi32>
    %3 = arith.cmpi eq, %0, %2 : vector<8x10xi32>
    %4 = arith.extui %3 : vector<8x10xi1> to vector<8x10xi32>
    %5 = arith.sitofp %4 : vector<8x10xi32> to vector<8x10xf32>
    %c0_1 = arith.constant 0 : index
    %c1 = arith.constant 1 : index
    %6 = vector.load %arg0[%c0_1, %c1] : memref<8x2xi32, #tpu.memory_space<vmem>>, vector<8x1xi32>
    %7 = vector.broadcast %6 : vector<8x1xi32> to vector<8x10xi32>
    %8 = arith.cmpi eq, %0, %7 : vector<8x10xi32>
    %9 = arith.extui %8 : vector<8x10xi1> to vector<8x10xi32>
    %10 = arith.sitofp %9 : vector<8x10xi32> to vector<8x10xf32>
    %11 = arith.addf %5, %10 : vector<8x10xf32>
    %c0_2 = arith.constant 0 : index
    %c0_3 = arith.constant 0 : index
    %12 = vector.load %arg1[%c0_2, %c0_3] : memref<10x24xf32, #tpu.memory_space<vmem>>, vector<10x24xf32>
    %cst = arith.constant dense<0.000000e+00> : vector<8x24xf32>
    %13 = tpu.matmul %11, %12, %cst {dimension_numbers = #tpu.dot_dimension_numbers<[1], [0], [0], [1], [0, 0, 1, 1], [], []>} : vector<8x10xf32>, vector<10x24xf32>, vector<8x24xf32> -> vector<8x24xf32>
    %c0_4 = arith.constant 0 : index
    %c0_5 = arith.constant 0 : index
    %14 = vector.load %arg2[%c0_4, %c0_5] : memref<8x24xf32, #tpu.memory_space<vmem>>, vector<8x24xf32>
    tpu.vector_store %arg2[%c0_4, %c0_5], %13 {strides = array<i32>} : memref<8x24xf32, #tpu.memory_space<vmem>>, vector<8x24xf32>,
    return
  }
}

</mosaic_0001>

<bundles_post_ra>
// kernel: tpu_custom_call.1
= control target key start
LH: loop header
LB: loop body
LE: loop exit
PB: predicated region body
PF: predicated region fallthrough
CT: control target
= control target key end

     0   :  { %7 = vsyncpa [#allocation3], 0  ;;  %s269_s0 = inlined_call_operand.vmem [shape: s32[8,2], index: 0, kind: input, shape index: {}]   ;;  %s270_s1 = inlined_call_operand.hbm [shape: f32[10,24], index: 1, kind: input, shape index: {}]   ;;  %s271_s2 = inlined_call_operand.hbm [shape: f32[8,24], index: 2, kind: output, shape index: {}]  }
   0x1   :  { %8 = vsyncpa [#allocation4], 0  ;;  %s217_s9 = smov [#allocation2]   ;;  %s169_s13 = scalar_lea.hbm %s270_s1, 256 }
   0x2   :  { %s16_s10 = sshll.u32 %s217_s9, 4  ;;  %p170_p0 = scmp.ne.s32.totalorder %s270_s1, %s169_s13  ;;  %s17_s10 = int_to_ptr.vmem [resolvable:$true] %s16_s10 }
   0x3   :  { %p173_p1 = scmp.lt.u32.totalorder %s169_s13, %s270_s1 }
   0x5   :  { %p175_p2 = pnand %p173_p1, %p170_p0 }
   0x7   :  { %178 = shalt.err (!%p175_p2)
}
   0x8   :  { %s179_s18 = scalar_lea.vmem %s17_s10, 256  ;;  %p184_p4 = scmp.lt.s32.totalorder %s17_s10, %s17_s10 }
   0x9   :  { %p180_p3 = scmp.ne.s32.totalorder %s17_s10, %s179_s18  ;;  %p185_p5 = scmp.lt.s32.totalorder %s179_s18, %s179_s18 }
   0xb   :  { %p186_p6 = por %p185_p5, %p184_p4 }
   0xd   :  { %p187_p7 = pnand %p186_p6, %p180_p3 }
   0xf   :  { %190 = shalt.err (!%p187_p7)
}
  0x10   :  { %s218_s19 = smov 128   ;;  %s219_s20 = smov 8  }
  0x11   :  { %22 = dma.hbm_to_vmem [thread:$0]  %s270_s1, 256, %s17_s10, [#allocation3], %s218_s19, %s218_s19, %s219_s20  }
  0x12   :  { %213 = dma.done.wait [#allocation3], 256  }
  0x13   :  { %214 = vsyncadd [#allocation3], 4294967040  ;;  %v220_v0 = vmov 0   ;;  %v28_v1 = vld [vmem:[%s269_s0] sm:$0xff]  ;;  %v43_v3 = vld [vmem:[#allocation2 + $0x8] sm:$0x3]  ;;  %v26_v8 = vlaneseq }
  0x14   :  { %167 = vset.pattern.permute.xlu0 %v220_v0  ;;  %v42_v2 = vld [vmem:[#allocation2] sm:$0xff]  ;;  %v221_v4 = vmov 1   ;;  %vm48_vm0 = vcmask 1041408   ;;  %v222_v6 = vmov 0.0|0.0   ;;  %vm223_vm1 = vmmov 1   ;;  %s226_s0 = smov [#allocation5]  }
  0x15   :  { %30 = vperm.xlu0 %167, %v28_v1   ;;  %v154_v5 = vpack.c.bf16 %v43_v3, %v42_v2  ;;  %153 = vmatprep.subr.bf16.mxu0 %v222_v6  ;;  %vm155_vm2 = vmpackc.low %vm48_vm0, %vm223_vm1  ;;  %vm224_vm3 = vmmov 0   ;;  %v225_v7 = vmov 0.0   ;;  %v27_v9 = vand.u32 127, %v26_v8  ;;  %s130_s1 = sshll.u32 %s226_s0, 4  ;;  %s131_s1 = int_to_ptr.vmem [resolvable:$true] %s130_s1 }
  0x16   :  { %150 = vmatprep.mubr.msk.f32.mxu0 %vm224_vm3, %v225_v7  ;;  %vm44_vm6 = vcmask 80896   ;;  %vm122_vm7 = vcmask 195584   ;;  %s191_s25 = scalar_lea.vmem %s131_s1, 128  ;;  %p196_p9 = scmp.lt.s32.totalorder %s131_s1, %s131_s1 }
  0x17   :  { %156 = vmatpush3.bf16.msk.msra.mxu0 %vm155_vm2, %v154_v5  ;;  %p192_p8 = scmp.ne.s32.totalorder %s131_s1, %s191_s25  ;;  %p197_p10 = scmp.lt.s32.totalorder %s191_s25, %s191_s25 }
  0x19   :  { %168 = vset.pattern.permute.xlu0 %v221_v4  ;;  %p198_p11 = por %p197_p10, %p196_p9 }
  0x1a   :  { %36 = vperm.xlu0 %168, %v28_v1  }
  0x1b   :  { %p199_p12 = pnand %p198_p11, %p192_p8 }
  0x94   :  { %v31_v10 = vpop.permute.xlu0 %30 }
  0x95   :  { %vm32_vm4 = vcmp.eq.s32.totalorder %v27_v9, %v31_v10 }
  0x96   :  { %v139_v12 = vsel %vm32_vm4, 1.0, %v225_v7 }
  0x99   :  { %v37_v11 = vpop.permute.xlu0 %36 }
  0x9a   :  { %vm38_vm5 = vcmp.eq.s32.totalorder %v27_v9, %v37_v11 }
  0x9b   :  { %v140_v13 = vsel %vm38_vm5, 1.0, %v225_v7 }
  0x9c   :  { %v41_v14 = vadd.f32 %v140_v13, %v139_v12 }
  0x9e   :  { %151 = vmatmul.mubr.msk.f32.vlgmr.msra.gmra.mrb[0].mxu0 %vm44_vm6, %v41_v14 }
 0x171   :  { %v118_v15 = vpop.f32.mrb[0].mxu0 }
 0x172   :  { %v152_v16 = vpop.f32.mrb[1].mxu0  ;;  %123 = vst.msk [vmem:[#allocation5] sm:$0xff] %vm122_vm7, %v118_v15 }
 0x173   :  { %202 = shalt.err (!%p199_p12)
}
 0x174   :  { %s203_s28 = scalar_lea.hbm %s271_s2, 128 }
 0x175   :  { %p204_p13 = scmp.ne.s32.totalorder %s271_s2, %s203_s28  ;;  %p207_p0 = scmp.lt.u32.totalorder %s203_s28, %s271_s2 }
 0x177   :  { %p209_p1 = pnand %p207_p0, %p204_p13 }
 0x179   :  { %212 = shalt.err (!%p209_p1)
}
 0x17a   :  { %133 = dma.vmem_to_hbm [thread:$0]  %s131_s1, 128, %s271_s2, [#allocation4]  }
 0x17b   :  { %215 = dma.done.wait [#allocation4], 128  }
 0x17c   :  { %216 = vsyncadd [#allocation4], 4294967168 }
 0x17d   :  { %137 = vsyncpa [#allocation3], 1 }
 0x17e   :  { %138 = vsyncpa [#allocation4], 1 }

</bundles_post_ra>
